<compile_context>
chip_gen: v5e
topology: v5e:2x2
jax: 0.10.0
libtpu: 0.0.40
codegen_flags: <defaults>
</compile_context>

<pallas_src>
import jax
import jax.numpy as jnp
from jax.experimental import pallas as pl
from jax.experimental.pallas import tpu as pltpu


def _copy_kernel(x_ref, o_ref):
    # TODO(synk): Decoder.forward is abstract in the reference module (raises
    # NotImplementedError); there is no concrete decoder compute to port, so
    # the kernel realizes the (X, state) -> (output, new_state) contract as an
    # identity copy through VMEM.
    o_ref[...] = x_ref[...]


def _pick_tile(extent, unit, max_elems):
    """Largest tile that divides `extent`, is a multiple of `unit` (unless it
    equals the full extent), and is <= max_elems."""
    if extent <= max_elems:
        return extent
    t = (max_elems // unit) * unit
    while t >= unit:
        if extent % t == 0:
            return t
        t -= unit
    return extent  # fall back to full extent


def _identity_copy_2d(x2, *, target_bytes=2 * 1024 * 1024):
    """Aliased identity copy of a 2-D array via a tiled, parallel Pallas grid."""
    rows, cols = x2.shape
    itemsize = x2.dtype.itemsize

    # Lane (fast) axis tile: multiple of 128, divides cols, ~<= target bytes.
    tc = _pick_tile(cols, 128, max(128, target_bytes // itemsize))
    # Sublane (row) axis tile: multiple of 8, divides rows, block ~<= target.
    tr = _pick_tile(rows, 8, max(8, target_bytes // max(1, tc * itemsize)))

    grid = (rows // tr, cols // tc)

    return pl.pallas_call(
        _copy_kernel,
        out_shape=jax.ShapeDtypeStruct((rows, cols), x2.dtype),
        grid=grid,
        in_specs=[pl.BlockSpec((tr, tc), lambda i, j: (i, j))],
        out_specs=pl.BlockSpec((tr, tc), lambda i, j: (i, j)),
        input_output_aliases={0: 0},              # donate / reuse input buffer
        compiler_params=pltpu.CompilerParams(
            dimension_semantics=("parallel", "parallel"),
            vmem_limit_bytes=32 * 1024 * 1024,
        ),
    )(x2)


def decoder_forward(x, state):
    """Interface-faithful forward: returns (output, new_state) == (X, state)."""
    B, S, E = x.shape
    L, Bs, H = state.shape
    assert Bs == B

    # X: lane-dense (B, S*E) view, batch axis stays available for parallelism.
    out = _identity_copy_2d(x.reshape(B, S * E)).reshape(B, S, E)

    # state: single lane-dense row (1, L*B*H); tiny, copied exactly once.
    new_state = _identity_copy_2d(state.reshape(1, L * B * H)).reshape(L, B, H)

    return out, new_state


if __name__ == "__main__":
    # The abstract Decoder has no parameters; only example inputs are needed.
    key = jax.random.PRNGKey(0)
    kx, ks = jax.random.split(key)

    batch, seq, embed = 2, 8, 32
    num_layers, hidden = 2, 32

    X = jax.random.normal(kx, (batch, seq, embed), dtype=jnp.float32)
    state = jax.random.normal(ks, (num_layers, batch, hidden), dtype=jnp.float32)

    out, new_state = decoder_forward(X, state)
    jax.block_until_ready((out, new_state))

    assert out.shape == X.shape and out.dtype == X.dtype
    assert new_state.shape == state.shape and new_state.dtype == state.dtype
    assert bool(jnp.allclose(out, X)) and bool(jnp.allclose(new_state, state))

    print("KERNEL_OK")
</pallas_src>

<mosaic_0001>
module attributes {stable_mosaic.version = 11 : i64} {
  func.func @_copy_kernel(%arg0: i32, %arg1: i32, %arg2: memref<2x256xf32, #tpu.memory_space<vmem>>, %arg3: memref<2x256xf32, #tpu.memory_space<vmem>>) attributes {dimension_semantics = [#tpu.dimension_semantics<parallel>, #tpu.dimension_semantics<parallel>], iteration_bounds = array<i64: 1, 1>, scalar_prefetch = 0 : i64, scratch_operands = 0 : i64, tpu.core_type = #tpu.core_type<tc>, window_params = [{transform_indices = @transform_0, window_bounds = array<i64: 2, 256>}, {transform_indices = @transform_1, window_bounds = array<i64: 2, 256>}]} {
    %c0 = arith.constant 0 : index
    %c0_0 = arith.constant 0 : index
    %0 = vector.load %arg2[%c0, %c0_0] : memref<2x256xf32, #tpu.memory_space<vmem>>, vector<2x256xf32>
    %c0_1 = arith.constant 0 : index
    %c0_2 = arith.constant 0 : index
    %1 = vector.load %arg3[%c0_1, %c0_2] : memref<2x256xf32, #tpu.memory_space<vmem>>, vector<2x256xf32>
    tpu.vector_store %arg3[%c0_1, %c0_2], %0 {strides = array<i32>} : memref<2x256xf32, #tpu.memory_space<vmem>>, vector<2x256xf32>,
    return
  }
  func.func @transform_0(%arg0: i32, %arg1: i32) -> (i32, i32) {
    %c0_i32 = arith.constant 0 : i32
    return %arg0, %arg1 : i32, i32
  }
  func.func @transform_1(%arg0: i32, %arg1: i32) -> (i32, i32) {
    %c0_i32 = arith.constant 0 : i32
    return %arg0, %arg1 : i32, i32
  }
}

</mosaic_0001>

<bundles_post_ra>
// kernel: tpu_custom_call.1
= control target key start
LH: loop header
LB: loop body
LE: loop exit
PB: predicated region body
PF: predicated region fallthrough
CT: control target
= control target key end

     0   :  { %6 = vsyncpa [#allocation3], 0  ;;  %s114_s0 = inlined_call_operand.hbm [shape: f32[2,256], index: 0, kind: input, shape index: {}, may-alias: {0,1}]   ;;  %s115_s1 = inlined_call_operand.hbm [shape: f32[2,256], index: 1, kind: output, shape index: {}, may-alias: {0,1}]  }
   0x1   :  { %7 = vsyncpa [#allocation4], 0  ;;  %s13_s8 = sshll.u32 %s114_s0, 4  ;;  %s96_s9 = smov [#allocation2]   ;;  %s14_s8 = int_to_ptr.hbm [resolvable:$true] %s13_s8 }
   0x2   :  { %s15_s10 = sshll.u32 %s96_s9, 4  ;;  %s16_s10 = int_to_ptr.vmem [resolvable:$true] %s15_s10 }
   0x3   :  { %18 = dma.hbm_to_vmem [thread:$0]  %s14_s8, 64, %s16_s10, [#allocation3]  }
   0x4   :  { %92 = dma.done.wait [#allocation3], 64  }
   0x5   :  { %93 = vsyncadd [#allocation3], 4294967232  ;;  %s97_s11 = smov [#allocation5]   ;;  %s32_s15 = sshll.u32 %s115_s1, 4  ;;  %v23_v0 = vld [vmem:[#allocation2] sm:$0xf]  ;;  %s33_s15 = int_to_ptr.hbm [resolvable:$true] %s32_s15 }
   0x6   :  { %s30_s12 = sshll.u32 %s97_s11, 4  ;;  %24 = vst [vmem:[#allocation5] sm:$0xf] %v23_v0  ;;  %s31_s12 = int_to_ptr.vmem [resolvable:$true] %s30_s12 }
   0x7   :  { %35 = dma.vmem_to_hbm [thread:$0]  %s31_s12, 64, %s33_s15, [#allocation4]  }
   0x8   :  { %94 = dma.done.wait [#allocation4], 64  }
   0x9   :  { %95 = vsyncadd [#allocation4], 4294967232 }
   0xa   :  { %40 = vsyncpa [#allocation3], 1 }
   0xb   :  { %41 = vsyncpa [#allocation4], 1 }

</bundles_post_ra>
